<compile_context>
chip_gen: v5e
topology: v5e:2x2
jax: 0.10.0
libtpu: 0.0.40
codegen_flags: <defaults>
</compile_context>

<pallas_src>
import jax
import jax.numpy as jnp
from jax.experimental import pallas as pl
from jax.experimental.pallas import tpu as pltpu


def _mha_kernel(img_ref, w_eff_ref, bias_ref, w_lin_ref, b_lin_ref, out_ref):
    """Fused attention-map head for a block of Bb batch elements.

    img_ref:   (Bb, D, S)  channel-major image encoding (S = H*W, full extent, any float dtype)
    w_eff_ref: (Bb, N, D)  f32 per-batch folded head weights (query scale already folded in)
    bias_ref:  (Bb, N, 1)  f32 per-batch folded head bias
    w_lin_ref: (1, N, 1)   f32 head-mixing Linear(N -> 1) weight, as a column
    b_lin_ref: (1, 1)      f32 head-mixing bias
    out_ref:   (Bb, S)     f32 sigmoid(attention logits)
    """
    # scores[b, n, s] = sum_d W_eff[b, n, d] * img[b, d, s] + bias_eff[b, n]
    scores = jnp.einsum(
        "bnd,bds->bns", w_eff_ref[...], img_ref[...],
        preferred_element_type=jnp.float32) + bias_ref[...]              # (Bb, N, S) f32

    # softmax over the flattened (heads * H * W) axis, per batch element.  The block's last dim
    # is the full H*W extent, so there are no padded lanes to mask.
    m = jnp.max(jnp.max(scores, axis=2, keepdims=True), axis=1, keepdims=True)    # (Bb, 1, 1)
    e = jnp.exp(scores - m)                                              # (Bb, N, S)
    denom = jnp.sum(jnp.sum(e, axis=2, keepdims=True), axis=1, keepdims=True)     # (Bb, 1, 1)
    inv = pl.reciprocal(denom, approx=False)                             # exact; (Bb,1,1) is cheap

    # Linear(N -> 1) over heads with 1/denom folded in (softmax-then-linear is linear in e),
    # then sigmoid.  Single sublane-dense store.
    mixed = jnp.sum(e * w_lin_ref[...], axis=1)                          # (Bb, S)
    logits = mixed * inv[:, :, 0] + b_lin_ref[...]                       # (Bb, S)
    out_ref[...] = jax.nn.sigmoid(logits)


def _round_up(x, m):
    return ((x + m - 1) // m) * m


def multi_head_attention(box_emb, img_enc, params, *, number_of_heads, batch_block=8):
    """Pallas forward pass matching MultiHeadAttention.forward (dropout == 0)."""
    B, Q, D = box_emb.shape
    Bi, Di, H, W = img_enc.shape
    assert B == Bi and D == Di
    assert Q == 1, "final .view(b, 1, h, w) in the reference module requires Q == 1"
    HW = H * W

    w_box, b_box, w_conv, b_conv, w_lin, b_lin = (
        params["w_box"], params["b_box"], params["w_conv"], params["b_conv"],
        params["w_lin"], params["b_lin"])
    HF = w_box.shape[0]
    N = number_of_heads
    C = HF // N
    norm = jnp.sqrt(jnp.float32(HF) / jnp.float32(N))

    # ---- cheap batched query path + algebraic fold, once in XLA (all tiny operands) -------
    #   W_eff[b,n,:]  = sum_c norm*box_h[b, n*C+c] * w_conv[n*C+c, :]
    #   bias_eff[b,n] = sum_c norm*box_h[b, n*C+c] * b_conv[n*C+c]
    box_h = (box_emb[:, 0, :].astype(jnp.float32) @ w_box.T.astype(jnp.float32)
             + b_box.astype(jnp.float32))                                # (B, HF)
    scaled = (norm * box_h).reshape(B, N, C)
    w_eff = jnp.einsum("bnc,ncd->bnd", scaled,
                       w_conv.reshape(N, C, D).astype(jnp.float32))      # (B, N, D) f32
    bias_eff = jnp.einsum("bnc,nc->bn", scaled,
                          b_conv.reshape(N, C).astype(jnp.float32))[:, :, None]   # (B, N, 1)
    w_lin_col = w_lin.reshape(1, N, 1).astype(jnp.float32)
    b_lin_sq = b_lin.reshape(1, 1).astype(jnp.float32)

    # The big operand: stream the image as-is (reshape is metadata-only; no pad, no cast pass).
    img_flat = img_enc.reshape(B, D, HW)

    # ---- VMEM-budget-aware batch blocking (no batch padding: Bb divides B) ----------------
    try:
        vmem_cap = int(getattr(pltpu.get_tpu_info(), "vmem_capacity_bytes",
                               64 * 1024 * 1024))
    except Exception:
        vmem_cap = 64 * 1024 * 1024
    vmem_budget = (vmem_cap * 3) // 4       # headroom for compiler scratch / second buffers

    img_item = jnp.dtype(img_flat.dtype).itemsize
    lane_hw = _round_up(HW, 128)

    def est_vmem(bb):
        per_buf = (bb * _round_up(D, 8) * lane_hw * img_item             # image block
                   + bb * _round_up(N, 8) * _round_up(D, 128) * 4        # w_eff block
                   + bb * _round_up(N, 8) * 128 * 4                      # bias block
                   + _round_up(bb, 8) * lane_hw * 4)                     # output block
        inter = 3 * bb * _round_up(N, 8) * lane_hw * 4                   # scores / e / mix (f32)
        return 2 * per_buf + inter + (2 << 20)                           # double-buffered + slack

    # Bb must divide B and (for a legal, sublane-dense 2-D out block) be B itself or a
    # multiple of 8.  Prefer the largest such divisor <= batch_block that fits the budget.
    cands = [d for d in range(1, B + 1) if B % d == 0 and (d == B or d % 8 == 0)]
    fitting = [d for d in cands if est_vmem(d) <= vmem_budget]
    pool = fitting if fitting else cands     # best effort if even the smallest over-shoots
    small = [d for d in pool if d <= max(1, int(batch_block))]
    Bb = max(small) if small else min(pool)
    grid_b = B // Bb
    # TODO(synk): for very large H*W, add an S grid axis with an online softmax instead of
    # relying on Bb shrinking to fit VMEM.

    vmem_limit = int(min(max(est_vmem(Bb) * 5 // 4, 32 * 1024 * 1024), vmem_budget))

    out = pl.pallas_call(
        _mha_kernel,
        out_shape=jax.ShapeDtypeStruct((B, HW), jnp.float32),
        grid_spec=pltpu.PrefetchScalarGridSpec(
            num_scalar_prefetch=0,
            grid=(grid_b,),
            in_specs=[
                pl.BlockSpec((Bb, D, HW), lambda b: (b, 0, 0)),   # image (streamed once)
                pl.BlockSpec((Bb, N, D), lambda b: (b, 0, 0)),    # folded head weights
                pl.BlockSpec((Bb, N, 1), lambda b: (b, 0, 0)),    # folded head bias
                pl.BlockSpec((1, N, 1), lambda b: (0, 0, 0)),     # head-mix weight (resident)
                pl.BlockSpec((1, 1), lambda b: (0, 0)),           # head-mix bias (resident)
            ],
            out_specs=pl.BlockSpec((Bb, HW), lambda b: (b, 0)),
        ),
        compiler_params=pltpu.CompilerParams(
            dimension_semantics=("parallel",),
            vmem_limit_bytes=vmem_limit,
        ),
    )(img_flat, w_eff, bias_eff, w_lin_col, b_lin_sq)

    return out.reshape(B, 1, H, W)


def reference(box_emb, img_enc, params, *, number_of_heads):
    """Pure-JAX re-implementation of the PyTorch forward (for verification)."""
    w_box, b_box, w_conv, b_conv, w_lin, b_lin = (
        params["w_box"], params["b_box"], params["w_conv"], params["b_conv"],
        params["w_lin"], params["b_lin"])
    B, Q, D = box_emb.shape
    _, _, H, W = img_enc.shape
    HF = w_box.shape[0]
    N = number_of_heads
    C = HF // N
    norm = jnp.sqrt(jnp.float32(HF / N))

    ob = box_emb @ w_box.T + b_box                                   # (B, Q, HF)
    oi = jnp.einsum("fd,bdhw->bfhw", w_conv, img_enc) + b_conv[None, :, None, None]
    ob = ob.reshape(B, Q, N, C)
    oi = oi.reshape(B, N, C, H, W)
    out = jnp.einsum("bqnc,bnchw->bqnhw", ob * norm, oi)
    shp = out.shape
    out = jax.nn.softmax(out.reshape(B, Q, -1), axis=-1).reshape(shp)
    out = jax.nn.sigmoid(jnp.einsum("bqnhw,n->bqhw", out, w_lin[0]) + b_lin[0])
    return out.reshape(B, 1, H, W)


if __name__ == "__main__":
    # shapes consistent with the module defaults
    B, Q = 2, 1
    D = 64          # query_dimension
    HF = 64         # hidden_features
    N = 16          # number_of_heads
    H = W = 8

    key = jax.random.PRNGKey(0)
    ks = jax.random.split(key, 12)
    box_emb = jax.random.normal(ks[0], (B, Q, D), jnp.float32)
    img_enc = jax.random.normal(ks[1], (B, D, H, W), jnp.float32)

    params = {
        "w_box": 0.1 * jax.random.normal(ks[2], (HF, D), jnp.float32),   # Linear weight (out, in)
        "b_box": 0.1 * jax.random.normal(ks[3], (HF,), jnp.float32),
        "w_conv": 0.1 * jax.random.normal(ks[4], (HF, D), jnp.float32),  # 1x1 conv weight squeezed
        "b_conv": 0.1 * jax.random.normal(ks[5], (HF,), jnp.float32),
        "w_lin": 0.1 * jax.random.normal(ks[6], (1, N), jnp.float32),    # Linear(N -> 1) weight
        "b_lin": 0.1 * jax.random.normal(ks[7], (1,), jnp.float32),
    }

    out = jax.block_until_ready(
        multi_head_attention(box_emb, img_enc, params, number_of_heads=N))
    ref = reference(box_emb, img_enc, params, number_of_heads=N)
    assert out.shape == (B, 1, H, W), out.shape
    assert jnp.allclose(out, ref, atol=3e-3, rtol=3e-3), float(jnp.max(jnp.abs(out - ref)))

    # config 2: non-128-multiple spatial size (HW = 81) and odd batch (Bb == B == 3, grid = 1)
    B2, H2, W2 = 3, 9, 9
    box2 = jax.random.normal(ks[8], (B2, Q, D), jnp.float32)
    img2 = jax.random.normal(ks[9], (B2, D, H2, W2), jnp.float32)
    out2 = jax.block_until_ready(
        multi_head_attention(box2, img2, params, number_of_heads=N))
    ref2 = reference(box2, img2, params, number_of_heads=N)
    assert out2.shape == (B2, 1, H2, W2), out2.shape
    assert jnp.allclose(out2, ref2, atol=3e-3, rtol=3e-3), float(jnp.max(jnp.abs(out2 - ref2)))

    # config 3: B = 16 -> Bb = 8, grid = 2 (multi-step grid + sublane-dense output blocks)
    B3, H3, W3 = 16, 8, 8
    box3 = jax.random.normal(ks[10], (B3, Q, D), jnp.float32)
    img3 = jax.random.normal(ks[11], (B3, D, H3, W3), jnp.float32)
    out3 = jax.block_until_ready(
        multi_head_attention(box3, img3, params, number_of_heads=N))
    ref3 = reference(box3, img3, params, number_of_heads=N)
    assert out3.shape == (B3, 1, H3, W3), out3.shape
    assert jnp.allclose(out3, ref3, atol=3e-3, rtol=3e-3), float(jnp.max(jnp.abs(out3 - ref3)))

    # TODO(synk): dropout (p=0.0 by default) is omitted; nonzero dropout would need pltpu PRNG.
    print("KERNEL_OK")
</pallas_src>

<mosaic_0001>
module attributes {stable_mosaic.version = 11 : i64} {
  func.func @_mha_kernel(%arg0: i32, %arg1: memref<2x64x64xf32, #tpu.memory_space<vmem>>, %arg2: memref<2x16x64xf32, #tpu.memory_space<vmem>>, %arg3: memref<2x16x1xf32, #tpu.memory_space<vmem>>, %arg4: memref<1x16x1xf32, #tpu.memory_space<vmem>>, %arg5: memref<1x1xf32, #tpu.memory_space<vmem>>, %arg6: memref<2x64xf32, #tpu.memory_space<vmem>>) attributes {dimension_semantics = [#tpu.dimension_semantics<parallel>], iteration_bounds = array<i64: 1>, scalar_prefetch = 0 : i64, scratch_operands = 0 : i64, tpu.core_type = #tpu.core_type<tc>, window_params = [{transform_indices = @transform_0, window_bounds = array<i64: 2, 64, 64>}, {transform_indices = @transform_1, window_bounds = array<i64: 2, 16, 64>}, {transform_indices = @transform_2, window_bounds = array<i64: 2, 16, 1>}, {pipeline_mode = #tpu.pipeline_mode<synchronous>, transform_indices = @transform_3, window_bounds = array<i64: 1, 16, 1>}, {pipeline_mode = #tpu.pipeline_mode<synchronous>, transform_indices = @transform_4, window_bounds = array<i64: 1, 1>}, {transform_indices = @transform_5, window_bounds = array<i64: 2, 64>}]} {
    %c0 = arith.constant 0 : index
    %c0_0 = arith.constant 0 : index
    %c0_1 = arith.constant 0 : index
    %0 = vector.load %arg2[%c0, %c0_0, %c0_1] : memref<2x16x64xf32, #tpu.memory_space<vmem>>, vector<2x16x64xf32>
    %c0_2 = arith.constant 0 : index
    %c0_3 = arith.constant 0 : index
    %c0_4 = arith.constant 0 : index
    %1 = vector.load %arg1[%c0_2, %c0_3, %c0_4] : memref<2x64x64xf32, #tpu.memory_space<vmem>>, vector<2x64x64xf32>
    "tpu.trace_start"() <{level = 10 : i32, message = "bnd,bds->bns"}> : () -> ()
    %cst = arith.constant dense<0.000000e+00> : vector<2x16x64xf32>
    %2 = tpu.matmul %0, %1, %cst {dimension_numbers = #tpu.dot_dimension_numbers<[2], [1], [1], [2], [0, 0, 0, 1, 1, 2], [0], [0]>} : vector<2x16x64xf32>, vector<2x64x64xf32>, vector<2x16x64xf32> -> vector<2x16x64xf32>
    "tpu.trace_stop"() : () -> ()
    %c0_5 = arith.constant 0 : index
    %c0_6 = arith.constant 0 : index
    %c0_7 = arith.constant 0 : index
    %3 = vector.load %arg3[%c0_5, %c0_6, %c0_7] : memref<2x16x1xf32, #tpu.memory_space<vmem>>, vector<2x16x1xf32>
    %4 = vector.broadcast %3 : vector<2x16x1xf32> to vector<2x16x64xf32>
    %5 = arith.addf %2, %4 : vector<2x16x64xf32>
    %cst_8 = arith.constant dense<0xFF800000> : vector<2x16xf32>
    %6 = vector.multi_reduction <maximumf>, %5, %cst_8 [2] : vector<2x16x64xf32> to vector<2x16xf32>
    %7 = vector.shape_cast %6 : vector<2x16xf32> to vector<2x16x1xf32>
    %cst_9 = arith.constant dense<0xFF800000> : vector<2x1xf32>
    %8 = vector.multi_reduction <maximumf>, %7, %cst_9 [1] : vector<2x16x1xf32> to vector<2x1xf32>
    %9 = vector.shape_cast %8 : vector<2x1xf32> to vector<2x1x1xf32>
    %10 = vector.broadcast %9 : vector<2x1x1xf32> to vector<2x16x64xf32>
    %11 = arith.subf %5, %10 : vector<2x16x64xf32>
    %12 = math.exp %11 : vector<2x16x64xf32>
    %cst_10 = arith.constant dense<0.000000e+00> : vector<2x16xf32>
    %13 = vector.multi_reduction <add>, %12, %cst_10 [2] : vector<2x16x64xf32> to vector<2x16xf32>
    %14 = vector.shape_cast %13 : vector<2x16xf32> to vector<2x16x1xf32>
    %cst_11 = arith.constant dense<0.000000e+00> : vector<2x1xf32>
    %15 = vector.multi_reduction <add>, %14, %cst_11 [1] : vector<2x16x1xf32> to vector<2x1xf32>
    %16 = vector.shape_cast %15 : vector<2x1xf32> to vector<2x1x1xf32>
    %17 = tpu.reciprocal %16 : vector<2x1x1xf32> -> vector<2x1x1xf32>
    %c0_12 = arith.constant 0 : index
    %c0_13 = arith.constant 0 : index
    %c0_14 = arith.constant 0 : index
    %18 = vector.load %arg4[%c0_12, %c0_13, %c0_14] : memref<1x16x1xf32, #tpu.memory_space<vmem>>, vector<1x16x1xf32>
    %19 = vector.broadcast %18 : vector<1x16x1xf32> to vector<2x16x64xf32>
    %20 = arith.mulf %12, %19 : vector<2x16x64xf32>
    %cst_15 = arith.constant dense<0.000000e+00> : vector<2x64xf32>
    %21 = vector.multi_reduction <add>, %20, %cst_15 [1] : vector<2x16x64xf32> to vector<2x64xf32>
    %22 = vector.shape_cast %17 : vector<2x1x1xf32> to vector<2x1xf32>
    %23 = vector.broadcast %22 : vector<2x1xf32> to vector<2x64xf32>
    %24 = arith.mulf %21, %23 : vector<2x64xf32>
    %c0_16 = arith.constant 0 : index
    %c0_17 = arith.constant 0 : index
    %25 = vector.load %arg5[%c0_16, %c0_17] : memref<1x1xf32, #tpu.memory_space<vmem>>, vector<1x1xf32>
    %26 = vector.broadcast %25 : vector<1x1xf32> to vector<2x64xf32>
    %27 = arith.addf %24, %26 : vector<2x64xf32>
    %28 = arith.negf %27 : vector<2x64xf32>
    %29 = math.exp %28 : vector<2x64xf32>
    %cst_18 = arith.constant 1.000000e+00 : f32
    %30 = vector.broadcast %cst_18 : f32 to vector<2x64xf32>
    %31 = arith.addf %30, %29 : vector<2x64xf32>
    %32 = arith.divf %30, %31 : vector<2x64xf32>
    %c0_19 = arith.constant 0 : index
    %c0_20 = arith.constant 0 : index
    %33 = vector.load %arg6[%c0_19, %c0_20] : memref<2x64xf32, #tpu.memory_space<vmem>>, vector<2x64xf32>
    tpu.vector_store %arg6[%c0_19, %c0_20], %32 {strides = array<i32>} : memref<2x64xf32, #tpu.memory_space<vmem>>, vector<2x64xf32>,
    return
  }
  func.func @transform_0(%arg0: i32) -> (i32, i32, i32) {
    %c0_i32 = arith.constant 0 : i32
    %c0_i32_0 = arith.constant 0 : i32
    %c0_i32_1 = arith.constant 0 : i32
    return %arg0, %c0_i32, %c0_i32_0 : i32, i32, i32
  }
  func.func @transform_1(%arg0: i32) -> (i32, i32, i32) {
    %c0_i32 = arith.constant 0 : i32
    %c0_i32_0 = arith.constant 0 : i32
    %c0_i32_1 = arith.constant 0 : i32
    return %arg0, %c0_i32, %c0_i32_0 : i32, i32, i32
  }
  func.func @transform_2(%arg0: i32) -> (i32, i32, i32) {
    %c0_i32 = arith.constant 0 : i32
    %c0_i32_0 = arith.constant 0 : i32
    %c0_i32_1 = arith.constant 0 : i32
    return %arg0, %c0_i32, %c0_i32_0 : i32, i32, i32
  }
  func.func @transform_3(%arg0: i32) -> (i32, i32, i32) {
    %c0_i32 = arith.constant 0 : i32
    %c0_i32_0 = arith.constant 0 : i32
    %c0_i32_1 = arith.constant 0 : i32
    %c0_i32_2 = arith.constant 0 : i32
    return %c0_i32, %c0_i32_0, %c0_i32_1 : i32, i32, i32
  }
  func.func @transform_4(%arg0: i32) -> (i32, i32) {
    %c0_i32 = arith.constant 0 : i32
    %c0_i32_0 = arith.constant 0 : i32
    %c0_i32_1 = arith.constant 0 : i32
    return %c0_i32, %c0_i32_0 : i32, i32
  }
  func.func @transform_5(%arg0: i32) -> (i32, i32) {
    %c0_i32 = arith.constant 0 : i32
    %c0_i32_0 = arith.constant 0 : i32
    return %arg0, %c0_i32 : i32, i32
  }
}

</mosaic_0001>

<bundles_post_ra>
// kernel: tpu_custom_call.1
= control target key start
LH: loop header
LB: loop body
LE: loop exit
PB: predicated region body
PF: predicated region fallthrough
CT: control target
= control target key end

     0   :  { %s540_s0 = inlined_call_operand.hbm [shape: f32[2,64,64], index: 0, kind: input, shape index: {}]   ;;  %s541_s1 = inlined_call_operand.vmem [shape: f32[2,16,64], index: 1, kind: input, shape index: {}]   ;;  %s542_s2 = inlined_call_operand.vmem [shape: f32[2,16,1], index: 2, kind: input, shape index: {}]   ;;  %s543_s3 = inlined_call_operand.vmem [shape: f32[1,16,1], index: 3, kind: input, shape index: {}]   ;;  %s544_s4 = inlined_call_operand.<no memory space> [shape: f32[1,1], index: 4, kind: input, shape index: {}]   ;;  %s545_s5 = inlined_call_operand.hbm [shape: f32[2,64], index: 5, kind: output, shape index: {}]  }
   0x1   :  { %v10_v0 = vstv %s544_s4 }
   0x2   :  { %11 = vst [vmem:[#allocation2] sm:$0x1] %v10_v0 }
   0x3   :  { %12 = vsyncpa [#allocation4], 0 }
   0x4   :  { %13 = vsyncpa [#allocation5], 0  ;;  %s18_s22 = sshll.u32 %s540_s0, 4  ;;  %s444_s23 = smov [#allocation3]   ;;  %s19_s22 = int_to_ptr.hbm [resolvable:$true] %s18_s22 }
   0x5   :  { %s20_s24 = sshll.u32 %s444_s23, 4  ;;  %s445_s25 = smov 128   ;;  %s21_s24 = int_to_ptr.vmem [resolvable:$true] %s20_s24 }
   0x6   :  { %s446_s26 = smov 8  }
   0x7   :  { %26 = dma.hbm_to_vmem [thread:$0]  %s19_s22, 2048, %s21_s24, [#allocation4], %s445_s25, %s445_s25, %s446_s26  }
   0x8   :  { %440 = dma.done.wait [#allocation4], 2048  }
   0x9   :  { %441 = vsyncadd [#allocation4], 4294965248  ;;  %v447_v1 = vmov 0   ;;  %v50_v2 = vld [vmem:[#allocation3 + $0x38] sm:$0xff]  ;;  %v49_v4 = vld [vmem:[#allocation3 + $0x30] sm:$0xff]  ;;  %vm83_vm0 = vcmask 523264  }
   0xa   :  { %368 = vset.pattern.permute.xlu0 %v447_v1  ;;  %369 = vset.pattern.permute.xlu1 %v447_v1  ;;  %v58_v3 = vld [vmem:[#allocation3 + $0x78] sm:$0xff]  ;;  %v57_v5 = vld [vmem:[#allocation3 + $0x70] sm:$0xff]  ;;  %v48_v6 = vld [vmem:[#allocation3 + $0x28] sm:$0xff]  ;;  %s331_s21 = sshll.u32 %s545_s5, 4  ;;  %vm319_vm15 = vcmask 1041409   ;;  %s332_s21 = int_to_ptr.hbm [resolvable:$true] %s331_s21 }
   0xb   :  { %370 = vset.pattern.permute.xlu2 %v447_v1  ;;  %98 = vmatpush.msra.mxu0 %v50_v2  ;;  %v56_v7 = vld [vmem:[#allocation3 + $0x68] sm:$0xff]  ;;  %v47_v8 = vld [vmem:[#allocation3 + $0x20] sm:$0xff]  ;;  %v46_v10 = vld [vmem:[#allocation3 + $0x18] sm:$0xff] }
   0xc   :  { %347 = vmatpush.msra.mxu2 %v50_v2  ;;  %127 = vmatpush.msra.mxu1 %v58_v3  ;;  %v55_v9 = vld [vmem:[#allocation3 + $0x60] sm:$0xff]  ;;  %v54_v11 = vld [vmem:[#allocation3 + $0x58] sm:$0xff]  ;;  %v45_v12 = vld [vmem:[#allocation3 + $0x10] sm:$0xff] }
   0xd   :  { %355 = vmatpush.msra.mxu3 %v58_v3  ;;  %99 = vmatpush.msra.mxu0 %v49_v4  ;;  %v53_v13 = vld [vmem:[#allocation3 + $0x50] sm:$0xff]  ;;  %v44_v14 = vld [vmem:[#allocation3 + $0x8] sm:$0xff]  ;;  %v43_v16 = vld [vmem:[#allocation3] sm:$0xff] }
   0xe   :  { %348 = vmatpush.msra.mxu2 %v49_v4  ;;  %128 = vmatpush.msra.mxu1 %v57_v5  ;;  %v52_v15 = vld [vmem:[#allocation3 + $0x48] sm:$0xff]  ;;  %v51_v17 = vld [vmem:[#allocation3 + $0x40] sm:$0xff]  ;;  %v42_v21 = vld [vmem:[%s541_s1 + $0x18] sm:$0xff] }
   0xf   :  { %356 = vmatpush.msra.mxu3 %v57_v5  ;;  %100 = vmatpush.msra.mxu0 %v48_v6  ;;  %v39_v18 = vld [vmem:[%s541_s1] sm:$0xff]  ;;  %v40_v19 = vld [vmem:[%s541_s1 + $0x8] sm:$0xff]  ;;  %v41_v20 = vld [vmem:[%s541_s1 + $0x10] sm:$0xff] }
  0x10   :  { %349 = vmatpush.msra.mxu2 %v48_v6  ;;  %129 = vmatpush.msra.mxu1 %v56_v7  ;;  %v59_v22 = vld [vmem:[%s542_s2] sm:$0xff]  ;;  %v61_v23 = vld [vmem:[%s542_s2 + $0x10] sm:$0xff]  ;;  %v60_v24 = vld [vmem:[%s542_s2 + $0x8] sm:$0xff] }
  0x11   :  { %357 = vmatpush.msra.mxu3 %v56_v7  ;;  %101 = vmatpush.msra.mxu0 %v47_v8  ;;  %v62_v25 = vld [vmem:[%s542_s2 + $0x18] sm:$0xff]  ;;  %v235_v42 = vld [vmem:[%s543_s3 + $0x8] sm:$0xff]  ;;  %v371_v43 = vld [vmem:[#allocation2] ss:$0 sm:$0xff] }
  0x12   :  { %350 = vmatpush.msra.mxu2 %v47_v8  ;;  %130 = vmatpush.msra.mxu1 %v55_v9 }
  0x13   :  { %358 = vmatpush.msra.mxu3 %v55_v9  ;;  %102 = vmatpush.msra.mxu0 %v46_v10 }
  0x14   :  { %351 = vmatpush.msra.mxu2 %v46_v10  ;;  %131 = vmatpush.msra.mxu1 %v54_v11 }
  0x15   :  { %359 = vmatpush.msra.mxu3 %v54_v11  ;;  %103 = vmatpush.msra.mxu0 %v45_v12 }
  0x16   :  { %352 = vmatpush.msra.mxu2 %v45_v12  ;;  %132 = vmatpush.msra.mxu1 %v53_v13 }
  0x17   :  { %360 = vmatpush.msra.mxu3 %v53_v13  ;;  %104 = vmatpush.msra.mxu0 %v44_v14 }
  0x18   :  { %353 = vmatpush.msra.mxu2 %v44_v14  ;;  %133 = vmatpush.msra.mxu1 %v52_v15  ;;  %v234_v14 = vld [vmem:[%s543_s3] sm:$0xff]  ;;  %s448_s3 = smov [#allocation6]  }
  0x19   :  { %361 = vmatpush.msra.mxu3 %v52_v15  ;;  %105 = vmatpush.msra.mxu0 %v43_v16  ;;  %s329_s18 = sshll.u32 %s448_s3, 4  ;;  %s330_s18 = int_to_ptr.vmem [resolvable:$true] %s329_s18 }
  0x1a   :  { %354 = vmatpush.msra.mxu2 %v43_v16  ;;  %134 = vmatpush.msra.mxu1 %v51_v17 }
  0x1b   :  { %362 = vmatpush.msra.mxu3 %v51_v17  ;;  %341 = vmatmul.msk.f32.vlgmr.msra.gmra.mxu0 %vm83_vm0, %v39_v18 }
  0x1c   :  { %342 = vmatmul.msk.f32.vlgmr.msra.gmra.mxu2 %vm83_vm0, %v40_v19  ;;  %343 = vmatmul.msk.f32.vlgmr.msra.gmra.mxu1 %vm83_vm0, %v41_v20 }
  0x1d   :  { %344 = vmatmul.msk.f32.vlgmr.msra.gmra.mxu3 %vm83_vm0, %v42_v21  ;;  %65 = vperm.xlu0 %368, %v59_v22  }
  0x1e   :  { %75 = vperm.xlu1 %369, %v61_v23  }
  0x25   :  { %70 = vperm.xlu0 %368, %v60_v24  }
  0x26   :  { %80 = vperm.xlu1 %369, %v62_v25  }
  0x8f   :  { %v66_v27 = vpop.permute.xlu0 %65 }
  0x90   :  { %v76_v26 = vpop.permute.xlu1 %75 }
  0x97   :  { %v71_v35 = vpop.permute.xlu0 %70 }
  0x98   :  { %v107_v28 = vpop.f32.mrf.mxu0  ;;  %v81_v34 = vpop.permute.xlu1 %80 }
  0x99   :  { %v108_v29 = vadd.f32 %v107_v28, %v66_v27  ;;  %v136_v30 = vpop.f32.mrf.mxu1 }
  0x9a   :  { %v137_v31 = vadd.f32 %v136_v30, %v76_v26 }
  0x9b   :  { %v142_v32 = vsel %vm83_vm0, %v108_v29, -inf }
  0x9c   :  { %v148_v33 = vsel %vm83_vm0, %v137_v31, -inf  ;;  %143 = vmax.xlane.f32.xlu2 %v142_v32 }
  0x9d   :  { %149 = vmax.xlane.f32.xlu0 %v148_v33 }
  0x9f   :  { %v110_v36 = vpop.f32.mrf.mxu2 }
  0xa0   :  { %v111_v37 = vadd.f32 %v110_v36, %v71_v35  ;;  %v139_v38 = vpop.f32.mrf.mxu3 }
  0xa1   :  { %v140_v39 = vadd.f32 %v139_v38, %v81_v34 }
  0xa2   :  { %v145_v41 = vsel %vm83_vm0, %v111_v37, -inf }
  0xa3   :  { %v151_v40 = vsel %vm83_vm0, %v140_v39, -inf }
  0xa4   :  { %152 = vmax.xlane.f32.xlu1 %v151_v40  ;;  %146 = vmax.xlane.f32.xlu2 %v145_v41 }
  0xb1   :  { %243 = vperm.xlu0 %368, %v235_v42  }
  0xbd   :  { %274 = vperm.xlu1 %369, %v371_v43  }
 0x10f   :  { %v144_v44 = vpop.xlane.xlu2 %143 }
 0x110   :  { %v150_v45 = vpop.xlane.xlu0 %149 }
 0x117   :  { %v153_v46 = vpop.xlane.xlu1 %152  ;;  %v147_v48 = vpop.xlane.xlu2 %146 }
 0x118   :  { %v161_v47 = vmax.f32 %v150_v45, %v153_v46  ;;  %v154_v49 = vmax.f32 %v144_v44, %v147_v48 }
 0x11a   :  { %v162_v50 = vrot.slane %v161_v47, 4  ;;  %v155_v51 = vrot.slane %v154_v49, 4 }
 0x11c   :  { %v156_v52 = vmax.f32 %v154_v49, %v155_v51  ;;  %v163_v53 = vmax.f32 %v161_v47, %v162_v50 }
 0x11e   :  { %v157_v54 = vrot.slane %v156_v52, 2  ;;  %v164_v56 = vrot.slane %v163_v53, 2 }
 0x120   :  { %v158_v55 = vmax.f32 %v156_v52, %v157_v54  ;;  %v165_v59 = vmax.f32 %v163_v53, %v164_v56 }
 0x122   :  { %v159_v57 = vrot.slane %v158_v55, 1  ;;  %v166_v62 = vrot.slane %v165_v59, 1 }
 0x124   :  { %v160_v58 = vmax.f32 %v158_v55, %v159_v57  ;;  %v167_v0 = vmax.f32 %v165_v59, %v166_v62 }
 0x126   :  { %v168_v60 = vsub.f32 %v108_v29, %v160_v58  ;;  %v169_v63 = vsub.f32 %v111_v37, %v160_v58  ;;  %v170_v3 = vsub.f32 %v137_v31, %v167_v0  ;;  %v171_v7 = vsub.f32 %v140_v39, %v167_v0  ;;  %v244_v29 = vpop.permute.xlu0 %243 }
 0x128   :  { %v172_v61 = vmul.f32 1.442695, %v168_v60  ;;  %v174_v1 = vmul.f32 1.442695, %v169_v63  ;;  %v176_v5 = vmul.f32 1.442695, %v170_v3 }
 0x129   :  { %v178_v9 = vmul.f32 1.442695, %v171_v7 }
 0x12a   :  { %372 = vpow2.f32 %v172_v61 }
 0x12b   :  { %374 = vpow2.f32 %v174_v1 }
 0x12c   :  { %376 = vpow2.f32 %v176_v5 }
 0x12d   :  { %378 = vpow2.f32 %v178_v9 }
 0x12f   :  { %v275_v9 = vpop.permute.xlu1 %274 }
 0x130   :  { %v373_v2 = vpop.eup %372 }
 0x131   :  { %v180_v4 = vsel %vm83_vm0, %v373_v2, 0.0  ;;  %v375_v6 = vpop.eup %374 }
 0x132   :  { %181 = vadd.xlane.f32.xlu2 %v180_v4  ;;  %v183_v8 = vsel %vm83_vm0, %v375_v6, 0.0  ;;  %v377_v10 = vpop.eup %376  ;;  %v247_v33 = vmul.f32 %v375_v6, %v244_v29 }
 0x133   :  { %v186_v11 = vsel %vm83_vm0, %v377_v10, 0.0  ;;  %v379_v12 = vpop.eup %378 }
 0x134   :  { %v189_v13 = vsel %vm83_vm0, %v379_v12, 0.0  ;;  %v249_v31 = vmul.f32 %v379_v12, %v244_v29  ;;  %v251_v41 = vsel %vm83_vm0, %v247_v33, 0.0 }
 0x136   :  { %v260_v39 = vsel %vm83_vm0, %v249_v31, 0.0 }
 0x13a   :  { %184 = vadd.xlane.f32.xlu2 %v183_v8 }
 0x142   :  { %187 = vadd.xlane.f32.xlu2 %v186_v11 }
 0x14a   :  { %190 = vadd.xlane.f32.xlu2 %v189_v13 }
 0x162   :  { %238 = vperm.xlu2 %370, %v234_v14  }
 0x1a5   :  { %v182_v15 = vpop.xlane.xlu2 %181 }
 0x1ad   :  { %v185_v16 = vpop.xlane.xlu2 %184 }
 0x1ae   :  { %v192_v17 = vadd.f32 %v185_v16, %v182_v15 }
 0x1b0   :  { %v193_v18 = vrot.slane %v192_v17, 4 }
 0x1b2   :  { %v194_v19 = vadd.f32 %v193_v18, %v192_v17 }
 0x1b4   :  { %v195_v20 = vrot.slane %v194_v19, 2 }
 0x1b5   :  { %v188_v21 = vpop.xlane.xlu2 %187 }
 0x1b6   :  { %v196_v22 = vadd.f32 %v195_v20, %v194_v19 }
 0x1b8   :  { %v197_v23 = vrot.slane %v196_v22, 1 }
 0x1ba   :  { %v198_v24 = vadd.f32 %v197_v23, %v196_v22 }
 0x1bc   :  { %380 = vrcp.f32 %v198_v24  ;;  %v217_v56 = vand.u32 2147483648, %v198_v24  ;;  %vm211_vm2 = vweird.f32 %v198_v24  ;;  %v215_v57 = vand.u32 2147483647, %v198_v24 }
 0x1bd   :  { %v191_v25 = vpop.xlane.xlu2 %190 }
 0x1be   :  { %v199_v26 = vadd.f32 %v191_v25, %v188_v21  ;;  %v218_v0 = vor.u32 1.1754944e-38, %v217_v56  ;;  %vm216_vm4 = vcmp.eq.f32.partialorder %v215_v57, 8.507059e+37 }
 0x1c0   :  { %v200_v27 = vrot.slane %v199_v26, 4 }
 0x1c2   :  { %v381_v28 = vpop.eup %380  ;;  %v201_v30 = vadd.f32 %v200_v27, %v199_v26 }
 0x1c3   :  { %v207_v32 = vmul.f32 %v381_v28, %v198_v24  ;;  %vm212_vm1 = vweird.f32 %v381_v28 }
 0x1c4   :  { %v202_v34 = vrot.slane %v201_v30, 2  ;;  %vm213_vm3 = vmor %vm211_vm2, %vm212_vm1  ;;  %vm322_vm2 = vcmask 517120  }
 0x1c5   :  { %v239_v35 = vpop.permute.xlu2 %238  ;;  %v208_v40 = vsub.f32 1.0, %v207_v32 }
 0x1c6   :  { %v203_v36 = vadd.f32 %v202_v34, %v201_v30  ;;  %v246_v37 = vmul.f32 %v373_v2, %v239_v35  ;;  %v248_v38 = vmul.f32 %v377_v10, %v239_v35 }
 0x1c7   :  { %v209_v48 = vmul.f32 %v381_v28, %v208_v40 }
 0x1c8   :  { %v204_v42 = vrot.slane %v203_v36, 1  ;;  %v250_v43 = vsel %vm83_vm0, %v246_v37, 0.0  ;;  %v259_v44 = vsel %vm83_vm0, %v248_v38, 0.0 }
 0x1c9   :  { %v252_v45 = vadd.f32 %v251_v41, %v250_v43  ;;  %v261_v46 = vadd.f32 %v260_v39, %v259_v44  ;;  %v210_v53 = vadd.f32 %v381_v28, %v209_v48 }
 0x1ca   :  { %v205_v47 = vadd.f32 %v204_v42, %v203_v36 }
 0x1cb   :  { %v253_v49 = vrot.slane %v252_v45, 4  ;;  %v262_v50 = vrot.slane %v261_v46, 4  ;;  %v214_v61 = vsel %vm213_vm3, %v381_v28, %v210_v53 }
 0x1cc   :  { %382 = vrcp.f32 %v205_v47  ;;  %v219_v3 = vsel %vm216_vm4, %v218_v0, %v214_v61  ;;  %v229_v4 = vand.u32 2147483647, %v205_v47  ;;  %v231_v5 = vand.u32 2147483648, %v205_v47 }
 0x1cd   :  { %v254_v51 = vadd.f32 %v253_v49, %v252_v45  ;;  %v263_v52 = vadd.f32 %v262_v50, %v261_v46  ;;  %vm225_vm6 = vweird.f32 %v205_v47 }
 0x1ce   :  { %v232_v12 = vor.u32 1.1754944e-38, %v231_v5  ;;  %vm230_vm8 = vcmp.eq.f32.partialorder %v229_v4, 8.507059e+37 }
 0x1cf   :  { %v255_v54 = vrot.slane %v254_v51, 2  ;;  %v264_v55 = vrot.slane %v263_v52, 2 }
 0x1d1   :  { %v256_v58 = vadd.f32 %v255_v54, %v254_v51  ;;  %v265_v63 = vadd.f32 %v264_v55, %v263_v52 }
 0x1d2   :  { %v383_v59 = vpop.eup %382 }
 0x1d3   :  { %v221_v60 = vmul.f32 %v383_v59, %v205_v47  ;;  %v257_v62 = vrot.slane %v256_v58, 1  ;;  %vm226_vm5 = vweird.f32 %v383_v59  ;;  %v266_v7 = vrot.slane %v265_v63, 1 }
 0x1d4   :  { %vm227_vm7 = vmor %vm225_vm6, %vm226_vm5 }
 0x1d5   :  { %v222_v1 = vsub.f32 1.0, %v221_v60  ;;  %v258_v2 = vadd.f32 %v257_v62, %v256_v58  ;;  %v267_v14 = vadd.f32 %v266_v7, %v265_v63 }
 0x1d7   :  { %v223_v6 = vmul.f32 %v383_v59, %v222_v1  ;;  %v268_v8 = vmul.f32 %v258_v2, %v219_v3 }
 0x1d9   :  { %v224_v10 = vadd.f32 %v383_v59, %v223_v6  ;;  %v277_v11 = vadd.f32 %v275_v9, %v268_v8 }
 0x1db   :  { %v228_v13 = vsel %vm227_vm7, %v383_v59, %v224_v10  ;;  %v345_v15 = vmul.f32 -1.442695, %v277_v11 }
 0x1dc   :  { %v233_v16 = vsel %vm230_vm8, %v232_v12, %v228_v13 }
 0x1dd   :  { %v269_v17 = vmul.f32 %v267_v14, %v233_v16  ;;  %384 = vpow2.f32 %v345_v15 }
 0x1df   :  { %v278_v18 = vadd.f32 %v275_v9, %v269_v17 }
 0x1e1   :  { %v346_v19 = vmul.f32 -1.442695, %v278_v18 }
 0x1e3   :  { %v385_v20 = vpop.eup %384  ;;  %386 = vpow2.f32 %v346_v19 }
 0x1e4   :  { %v285_v21 = vadd.f32 1.0, %v385_v20 }
 0x1e6   :  { %388 = vrcp.f32 %v285_v21  ;;  %vm292_vm10 = vweird.f32 %v285_v21  ;;  %v298_v32 = vand.u32 2147483648, %v285_v21  ;;  %v296_v34 = vand.u32 2147483647, %v285_v21 }
 0x1e8   :  { %v299_v40 = vor.u32 1.1754944e-38, %v298_v32  ;;  %vm297_vm0 = vcmp.eq.f32.partialorder %v296_v34, 8.507059e+37 }
 0x1e9   :  { %v387_v22 = vpop.eup %386 }
 0x1ea   :  { %v286_v23 = vadd.f32 1.0, %v387_v22 }
 0x1ec   :  { %v389_v24 = vpop.eup %388  ;;  %390 = vrcp.f32 %v286_v23  ;;  %v313_v33 = vand.u32 2147483648, %v286_v23  ;;  %v311_v36 = vand.u32 2147483647, %v286_v23  ;;  %vm307_vm13 = vweird.f32 %v286_v23 }
 0x1ed   :  { %v288_v25 = vmul.f32 %v389_v24, %v285_v21  ;;  %vm293_vm9 = vweird.f32 %v389_v24 }
 0x1ee   :  { %vm531_vm12 = vmor %vm292_vm10, %vm293_vm9  ;;  %v314_v41 = vor.u32 1.1754944e-38, %v313_v33  ;;  %vm312_vm1 = vcmp.eq.f32.partialorder %v311_v36, 8.507059e+37 }
 0x1ef   :  { %v289_v26 = vsub.f32 1.0, %v288_v25 }
 0x1f1   :  { %v290_v27 = vmul.f32 %v389_v24, %v289_v26 }
 0x1f2   :  { %v391_v28 = vpop.eup %390 }
 0x1f3   :  { %v303_v29 = vmul.f32 %v391_v28, %v286_v23  ;;  %v291_v30 = vadd.f32 %v389_v24, %v290_v27  ;;  %vm308_vm11 = vweird.f32 %v391_v28 }
 0x1f4   :  { %vm309_vm14 = vmor %vm307_vm13, %vm308_vm11 }
 0x1f5   :  { %v304_v31 = vsub.f32 1.0, %v303_v29  ;;  %v295_v38 = vsel %vm531_vm12, %v389_v24, %v291_v30 }
 0x1f6   :  { %v300_v43 = vsel %vm297_vm0, %v299_v40, %v295_v38 }
 0x1f7   :  { %v305_v35 = vmul.f32 %v391_v28, %v304_v31 }
 0x1f9   :  { %v306_v39 = vadd.f32 %v391_v28, %v305_v35 }
 0x1fb   :  { %v310_v42 = vsel %vm309_vm14, %v391_v28, %v306_v39 }
 0x1fc   :  { %v315_v44 = vsel %vm312_vm1, %v314_v41, %v310_v42 }
 0x1fd   :  { %v320_v45 = vsel %vm319_vm15, %v315_v44, %v300_v43 }
 0x1fe   :  { %323 = vst.msk [vmem:[#allocation6] sm:$0x3] %vm322_vm2, %v320_v45 }
 0x1ff   :  { %334 = dma.vmem_to_hbm [thread:$0]  %s330_s18, 32, %s332_s21, [#allocation5]  }
 0x200   :  { %442 = dma.done.wait [#allocation5], 32  }
 0x201   :  { %443 = vsyncadd [#allocation5], 4294967264 }
 0x202   :  { %339 = vsyncpa [#allocation4], 1 }
 0x203   :  { %340 = vsyncpa [#allocation5], 1 }

</bundles_post_ra>
